<compile_context>
chip_gen: v5e
topology: v5e:2x2
jax: 0.10.0
libtpu: 0.0.40
codegen_flags: <defaults>
</compile_context>

<pallas_src>
import functools

import jax
import jax.numpy as jnp
from jax.experimental import pallas as pl
from jax.experimental.pallas import tpu as pltpu


def _round_up(x, m):
    return ((x + m - 1) // m) * m


def _pad2(x, rows, cols, value=0.0):
    pr = rows - x.shape[0]
    pc = cols - x.shape[1]
    if pr == 0 and pc == 0:
        return x
    return jnp.pad(x, ((0, pr), (0, pc)), constant_values=value)


def _pick_tb(b, cap, align):
    # >= 2 programs on the "parallel" batch axis when B allows (v7x megacore),
    # sublane-aligned (16 for bf16-tiled features), capped for VMEM residency.
    half = _round_up(max(1, -(-b // 2)), align)
    return max(align, min(cap, half))


# ----------------------------------------------------------------------------
# 1-D label branch: one class per sample -> per-sample center gather.
# ----------------------------------------------------------------------------
def _center_loss_1d_kernel(lab_ref, f_ref, c_hbm, w_ref, o_ref, gath, sem, *, tb):
    # lab_ref: (B_pad,) int32 in SMEM (scalar prefetch) -- gather indices
    # f_ref:   (TB, D)  f32 feature tile
    # c_hbm:   (C, D)   f32 centers, left in HBM (memory_space=pl.ANY)
    # w_ref:   (TB, 1)  f32 numeric label value (PyTorch: value *= labels[i])
    # o_ref:   (TB, 1)  per-sample clipped loss value
    # gath:    (TB, D)  VMEM scratch for the gathered center rows
    # sem:     DMA semaphore shared by the TB row gathers
    base = pl.program_id(0) * tb

    @pl.loop(0, tb)
    def _issue(r):
        idx = lab_ref[base + r]
        pltpu.make_async_copy(c_hbm.at[idx], gath.at[r], sem).start()

    @pl.loop(0, tb)
    def _wait(r):
        pltpu.make_async_copy(c_hbm.at[0], gath.at[r], sem).wait()

    diff = f_ref[...] - gath[...]
    d2 = jnp.sum(diff * diff, axis=1, keepdims=True)            # (TB, 1)
    # PyTorch: value = distmat[i, y_i]; value *= labels[i]; clamp(1e-12, 1e12).
    o_ref[...] = jnp.clip(d2 * w_ref[...], 1e-12, 1e12)


def _center_loss_1d(feature, labels, centers):
    B, D = feature.shape
    C = centers.shape[0]

    TB = _pick_tb(B, 256, 8)
    B_pad = _round_up(B, TB)

    f = _pad2(feature.astype(jnp.float32), B_pad, D)
    lab = labels.reshape(-1).astype(jnp.int32)
    lab_idx = jnp.clip(lab, 0, C - 1)                    # safe HBM gather index
    lab_w = lab.astype(jnp.float32).reshape(B, 1)
    if B_pad != B:
        lab_idx = jnp.pad(lab_idx, (0, B_pad - B))       # pad -> row 0 (valid)
        lab_w = jnp.pad(lab_w, ((0, B_pad - B), (0, 0))) # pad -> weight 0

    grid = (B_pad // TB,)
    kernel = functools.partial(_center_loss_1d_kernel, tb=TB)

    out = pl.pallas_call(
        kernel,
        out_shape=jax.ShapeDtypeStruct((B_pad, 1), jnp.float32),
        grid_spec=pltpu.PrefetchScalarGridSpec(
            num_scalar_prefetch=1,                       # labels -> SMEM
            grid=grid,
            in_specs=[
                pl.BlockSpec((TB, D), lambda i, lab: (i, 0)),   # feature tile
                pl.BlockSpec(memory_space=pl.ANY),              # centers in HBM
                pl.BlockSpec((TB, 1), lambda i, lab: (i, 0)),   # label value col
            ],
            out_specs=pl.BlockSpec((TB, 1), lambda i, lab: (i, 0)),
            scratch_shapes=[pltpu.VMEM((TB, D), jnp.float32),
                            pltpu.SemaphoreType.DMA],
        ),
        compiler_params=pltpu.CompilerParams(
            dimension_semantics=("parallel",)),
    )(lab_idx, f, centers.astype(jnp.float32), lab_w)

    # Mean over the B valid per-sample values (count is statically B).
    return jnp.mean(out[:B, 0])


# ----------------------------------------------------------------------------
# Multi-label / soft-label branch: labels is (B, C), mask = labels > 0.
# ----------------------------------------------------------------------------
def _fold_lanes(x, ncols):
    # (TB, ncols) -> (TB, 128) using 128-aligned static lane slices: pure VPU
    # adds, no cross-lane XLU work per grid step.
    acc = x[:, 0:128]
    for k in range(1, ncols // 128):
        acc = acc + x[:, k * 128:(k + 1) * 128]
    return acc


def _center_loss_ml_kernel(f_ref, ct_ref, c2_ref, f2_ref, w_ref,
                           tot_ref, cnt_ref, lane_tot, lane_cnt, *, tc):
    j = pl.program_id(1)

    @pl.when(j == 0)
    def _init():
        lane_tot[...] = jnp.zeros_like(lane_tot)
        lane_cnt[...] = jnp.zeros_like(lane_cnt)

    cross = jnp.dot(f_ref[...], ct_ref[...],
                    preferred_element_type=jnp.float32)          # (TB, TC) MXU
    dist = f2_ref[...] + c2_ref[...] - 2.0 * cross               # (TB, TC)

    w = w_ref[...]
    sel = w > 0.0
    val = jnp.where(sel, jnp.clip(dist * w, 1e-12, 1e12), 0.0)
    cnt = jnp.where(sel, 1.0, 0.0)
    lane_tot[...] += _fold_lanes(val, tc)
    lane_cnt[...] += _fold_lanes(cnt, tc)

    @pl.when(j == pl.num_programs(1) - 1)
    def _finalize():
        tot_ref[...] = jnp.sum(lane_tot[...], axis=1, keepdims=True)
        cnt_ref[...] = jnp.sum(lane_cnt[...], axis=1, keepdims=True)


def _center_loss_multilabel(feature, labels, centers):
    B, D = feature.shape
    C = centers.shape[0]

    TB = _pick_tb(B, 512, 16)                 # 16-aligned for the bf16 feature tile
    TC = min(_round_up(C, 128), 512)
    B_pad = _round_up(B, TB)
    C_pad = _round_up(C, TC)

    feat32 = feature.astype(jnp.float32)
    cent32 = centers.astype(jnp.float32)

    # bf16 for the streamed cross-term operands; exact norms / weights in f32.
    f_bf = _pad2(feat32, B_pad, D).astype(jnp.bfloat16)                    # (B_pad, D)
    ct_bf = _pad2(cent32.T, D, C_pad).astype(jnp.bfloat16)                 # (D, C_pad)
    f2 = _pad2(jnp.sum(feat32 * feat32, axis=1, keepdims=True), B_pad, 1)  # (B_pad, 1)
    c2 = _pad2(jnp.sum(cent32 * cent32, axis=1, keepdims=True).T, 1, C_pad)  # (1, C_pad)
    w = _pad2(labels.astype(jnp.float32), B_pad, C_pad)                    # zero pad -> masked

    grid = (B_pad // TB, C_pad // TC)
    kernel = functools.partial(_center_loss_ml_kernel, tc=TC)

    tot, cnt = pl.pallas_call(
        kernel,
        out_shape=(jax.ShapeDtypeStruct((B_pad, 1), jnp.float32),
                   jax.ShapeDtypeStruct((B_pad, 1), jnp.float32)),
        grid_spec=pltpu.PrefetchScalarGridSpec(
            num_scalar_prefetch=0,
            grid=grid,
            in_specs=[
                pl.BlockSpec((TB, D), lambda i, j: (i, 0)),     # feature (bf16)
                pl.BlockSpec((D, TC), lambda i, j: (0, j)),     # centers^T (bf16)
                pl.BlockSpec((1, TC), lambda i, j: (0, j)),     # ||c||^2 row (f32)
                pl.BlockSpec((TB, 1), lambda i, j: (i, 0)),     # ||f||^2 col (f32)
                pl.BlockSpec((TB, TC), lambda i, j: (i, j)),    # label weights (f32)
            ],
            out_specs=[pl.BlockSpec((TB, 1), lambda i, j: (i, 0)),
                       pl.BlockSpec((TB, 1), lambda i, j: (i, 0))],
            scratch_shapes=[pltpu.VMEM((TB, 128), jnp.float32),
                            pltpu.VMEM((TB, 128), jnp.float32)],
        ),
        compiler_params=pltpu.CompilerParams(
            dimension_semantics=("parallel", "arbitrary")),
    )(f_bf, ct_bf, c2, f2, w)

    # Padded rows/cols contribute 0 to both sums.
    return jnp.sum(tot) / jnp.sum(cnt)


def center_loss(feature, labels, centers):
    """JAX/Pallas equivalent of CenterLoss.forward.

    feature: (B, feat_dim) float
    labels:  (B,) int class ids  OR  (B, num_classes) float weights
    centers: (num_classes, feat_dim) float
    """
    if labels.ndim > 1 and labels.size > labels.shape[0]:
        return _center_loss_multilabel(feature, labels, centers)
    return _center_loss_1d(feature, labels, centers)


# ----------------------------------------------------------------------------
# Plain-JAX references mirroring the PyTorch forward.
# ----------------------------------------------------------------------------
def _reference_center_loss_1d(feature, labels, centers):
    C = centers.shape[0]
    distmat = (jnp.sum(feature ** 2, axis=1, keepdims=True)
               + jnp.sum(centers ** 2, axis=1)[None, :]
               - 2.0 * jnp.einsum("bd,cd->bc", feature, centers))
    mask = labels[:, None] == jnp.arange(C, dtype=labels.dtype)[None, :]
    picked = jnp.sum(jnp.where(mask, distmat, 0.0), axis=1)   # distmat[i, y_i]
    vals = jnp.clip(picked * labels.astype(jnp.float32), 1e-12, 1e12)
    return jnp.mean(vals)


def _reference_center_loss_multilabel(feature, labels, centers):
    distmat = (jnp.sum(feature ** 2, axis=1, keepdims=True)
               + jnp.sum(centers ** 2, axis=1)[None, :]
               - 2.0 * jnp.einsum("bd,cd->bc", feature, centers))
    mask = labels > 0
    vals = jnp.clip(distmat * labels, 1e-12, 1e12)
    return jnp.sum(jnp.where(mask, vals, 0.0)) / jnp.sum(mask)


if __name__ == "__main__":
    num_classes = 81
    feat_dim = 128
    batch = 8

    key = jax.random.PRNGKey(0)
    k_feat, k_cent, k_lab, k_ml = jax.random.split(key, 4)

    centers = jax.random.normal(k_cent, (num_classes, feat_dim), dtype=jnp.float32)
    feature = jax.random.normal(k_feat, (batch, feat_dim), dtype=jnp.float32)
    labels = jax.random.randint(k_lab, (batch,), 0, num_classes, dtype=jnp.int32)

    # Standard 1-D label branch (DMA-gathered centers, pure f32).
    loss = jax.block_until_ready(center_loss(feature, labels, centers))
    ref = jax.block_until_ready(_reference_center_loss_1d(feature, labels, centers))
    assert jnp.isfinite(loss), "1-D branch produced non-finite loss"
    assert jnp.allclose(loss, ref, rtol=2e-3, atol=1e-3), (loss, ref)

    # Multi-label / soft-label branch (bf16 cross term, f32 accumulation).
    u = jax.random.uniform(k_ml, (batch, num_classes), dtype=jnp.float32)
    soft = jnp.where(u > 0.9, u, 0.0)
    soft = soft.at[0, 0].set(0.5)   # guarantee at least one positive
    loss_ml = jax.block_until_ready(center_loss(feature, soft, centers))
    ref_ml = jax.block_until_ready(
        _reference_center_loss_multilabel(feature, soft, centers))
    assert jnp.isfinite(loss_ml), "multi-label branch produced non-finite loss"
    assert jnp.allclose(loss_ml, ref_ml, rtol=5e-3, atol=1e-3), (loss_ml, ref_ml)

    print("KERNEL_OK")
</pallas_src>

<mosaic_0001>
module attributes {stable_mosaic.version = 11 : i64} {
  func.func @_center_loss_1d_kernel(%arg0: i32, %arg1: memref<8xi32, #tpu.memory_space<smem>>, %arg2: memref<8x128xf32, #tpu.memory_space<vmem>>, %arg3: memref<81x128xf32, #tpu.memory_space<any>>, %arg4: memref<8x1xf32, #tpu.memory_space<vmem>>, %arg5: memref<8x1xf32, #tpu.memory_space<vmem>>, %arg6: memref<8x128xf32, #tpu.memory_space<vmem>>, %arg7: memref<!tpu.dma_semaphore, #tpu.memory_space<semaphore_mem>>) attributes {dimension_semantics = [#tpu.dimension_semantics<parallel>], iteration_bounds = array<i64: 1>, scalar_prefetch = 1 : i64, scratch_operands = 2 : i64, tpu.core_type = #tpu.core_type<tc>, window_params = [{transform_indices = @transform_0, window_bounds = array<i64: 8, 128>}, {}, {transform_indices = @transform_2, window_bounds = array<i64: 8, 1>}, {transform_indices = @transform_3, window_bounds = array<i64: 8, 1>}]} {
    %c8_i32 = arith.constant 8 : i32
    %0 = arith.muli %arg0, %c8_i32 : i32
    %c0_i32 = arith.constant 0 : i32
    %c8_i32_0 = arith.constant 8 : i32
    %1 = arith.addi %c0_i32, %c8_i32_0 : i32
    %c1_i32 = arith.constant 1 : i32
    scf.for %arg8 = %c0_i32 to %1 step %c1_i32  : i32 {
      %c1_i32_15 = arith.constant 1 : i32
      %16 = arith.muli %arg8, %c1_i32_15 : i32
      %c0_i32_16 = arith.constant 0 : i32
      %17 = arith.addi %c0_i32_16, %16 : i32
      %18 = arith.addi %0, %17 : i32
      %19 = arith.index_cast %18 : i32 to index
      %20 = memref.load %arg1[%19] : memref<8xi32, #tpu.memory_space<smem>>
      %c0_i32_17 = arith.constant 0 : i32
      %21 = tpu.memref_slice %arg3[%20, %c0_i32_17] : memref<81x128xf32, #tpu.memory_space<any>> -> memref<1x128xf32, #tpu.memory_space<any>>
      %22 = tpu.memref_squeeze %21 : memref<1x128xf32, #tpu.memory_space<any>> -> memref<128xf32, #tpu.memory_space<any>>
      %c0_i32_18 = arith.constant 0 : i32
      %23 = tpu.memref_slice %arg6[%17, %c0_i32_18] : memref<8x128xf32, #tpu.memory_space<vmem>> -> memref<1x128xf32, #tpu.memory_space<vmem>>
      %24 = tpu.memref_squeeze %23 : memref<1x128xf32, #tpu.memory_space<vmem>> -> memref<128xf32, #tpu.memory_space<vmem>>
      tpu.enqueue_dma source(%22 : memref<128xf32, #tpu.memory_space<any>>) target(%24 : memref<128xf32, #tpu.memory_space<vmem>>) target_semaphore(%arg7 : memref<!tpu.dma_semaphore, #tpu.memory_space<semaphore_mem>>)
    }
    %c8_i32_1 = arith.constant 8 : i32
    %c0_i32_2 = arith.constant 0 : i32
    %c8_i32_3 = arith.constant 8 : i32
    %2 = arith.addi %c0_i32_2, %c8_i32_3 : i32
    %c1_i32_4 = arith.constant 1 : i32
    scf.for %arg8 = %c0_i32_2 to %2 step %c1_i32_4  : i32 {
      %c1_i32_15 = arith.constant 1 : i32
      %16 = arith.muli %arg8, %c1_i32_15 : i32
      %c0_i32_16 = arith.constant 0 : i32
      %17 = arith.addi %c0_i32_16, %16 : i32
      %c0_i32_17 = arith.constant 0 : i32
      %c0_i32_18 = arith.constant 0 : i32
      %18 = tpu.memref_slice %arg3[%c0_i32_17, %c0_i32_18] : memref<81x128xf32, #tpu.memory_space<any>> -> memref<1x128xf32, #tpu.memory_space<any>>
      %19 = tpu.memref_squeeze %18 : memref<1x128xf32, #tpu.memory_space<any>> -> memref<128xf32, #tpu.memory_space<any>>
      %c0_i32_19 = arith.constant 0 : i32
      %20 = tpu.memref_slice %arg6[%17, %c0_i32_19] : memref<8x128xf32, #tpu.memory_space<vmem>> -> memref<1x128xf32, #tpu.memory_space<vmem>>
      %21 = tpu.memref_squeeze %20 : memref<1x128xf32, #tpu.memory_space<vmem>> -> memref<128xf32, #tpu.memory_space<vmem>>
      tpu.wait_dma2 semaphore(%arg7 : memref<!tpu.dma_semaphore, #tpu.memory_space<semaphore_mem>>) src(%19 : memref<128xf32, #tpu.memory_space<any>>) dst(%21 : memref<128xf32, #tpu.memory_space<vmem>>)
    }
    %c8_i32_5 = arith.constant 8 : i32
    %c0 = arith.constant 0 : index
    %c0_6 = arith.constant 0 : index
    %3 = vector.load %arg2[%c0, %c0_6] : memref<8x128xf32, #tpu.memory_space<vmem>>, vector<8x128xf32>
    %c0_7 = arith.constant 0 : index
    %c0_8 = arith.constant 0 : index
    %4 = vector.load %arg6[%c0_7, %c0_8] : memref<8x128xf32, #tpu.memory_space<vmem>>, vector<8x128xf32>
    %5 = arith.subf %3, %4 : vector<8x128xf32>
    %6 = arith.mulf %5, %5 : vector<8x128xf32>
    %cst = arith.constant dense<0.000000e+00> : vector<8xf32>
    %7 = vector.multi_reduction <add>, %6, %cst [1] : vector<8x128xf32> to vector<8xf32>
    %8 = vector.shape_cast %7 : vector<8xf32> to vector<8x1xf32>
    %c0_9 = arith.constant 0 : index
    %c0_10 = arith.constant 0 : index
    %9 = vector.load %arg4[%c0_9, %c0_10] : memref<8x1xf32, #tpu.memory_space<vmem>>, vector<8x1xf32>
    %10 = arith.mulf %8, %9 : vector<8x1xf32>
    %cst_11 = arith.constant 9.99999996E-13 : f32
    %cst_12 = arith.constant 9.99999995E+11 : f32
    %11 = vector.broadcast %cst_11 : f32 to vector<8x1xf32>
    %12 = arith.maximumf %11, %10 : vector<8x1xf32>
    %13 = vector.broadcast %cst_12 : f32 to vector<8x1xf32>
    %14 = arith.minimumf %13, %12 : vector<8x1xf32>
    %c0_13 = arith.constant 0 : index
    %c0_14 = arith.constant 0 : index
    %15 = vector.load %arg5[%c0_13, %c0_14] : memref<8x1xf32, #tpu.memory_space<vmem>>, vector<8x1xf32>
    tpu.vector_store %arg5[%c0_13, %c0_14], %14 {strides = array<i32>} : memref<8x1xf32, #tpu.memory_space<vmem>>, vector<8x1xf32>,
    return
  }
  func.func @transform_0(%arg0: i32, %arg1: memref<8xi32, #tpu.memory_space<smem>>) -> (i32, i32) {
    %c0_i32 = arith.constant 0 : i32
    %c0_i32_0 = arith.constant 0 : i32
    return %arg0, %c0_i32 : i32, i32
  }
  func.func @transform_2(%arg0: i32, %arg1: memref<8xi32, #tpu.memory_space<smem>>) -> (i32, i32) {
    %c0_i32 = arith.constant 0 : i32
    %c0_i32_0 = arith.constant 0 : i32
    return %arg0, %c0_i32 : i32, i32
  }
  func.func @transform_3(%arg0: i32, %arg1: memref<8xi32, #tpu.memory_space<smem>>) -> (i32, i32) {
    %c0_i32 = arith.constant 0 : i32
    %c0_i32_0 = arith.constant 0 : i32
    return %arg0, %c0_i32 : i32, i32
  }
}

</mosaic_0001>

<bundles_post_ra>
// kernel: tpu_custom_call.1
= control target key start
LH: loop header
LB: loop body
LE: loop exit
PB: predicated region body
PF: predicated region fallthrough
CT: control target
= control target key end

     0   :  { %s161_s18 = smov [#allocation5]   ;;  %s219_s0 = inlined_call_operand.vmem [shape: s32[8], index: 0, kind: input, shape index: {}]   ;;  %s220_s1 = inlined_call_operand.vmem [shape: f32[8,128], index: 1, kind: input, shape index: {}]   ;;  %s221_s2 = inlined_call_operand.hbm [shape: f32[81,128], index: 2, kind: input, shape index: {}]   ;;  %s222_s3 = inlined_call_operand.vmem [shape: f32[8,1], index: 3, kind: input, shape index: {}]   ;;  %s223_s4 = inlined_call_operand.vmem [shape: f32[8,1], index: 4, kind: output, shape index: {}]  }
   0x1   :  { %s10_s17 = sshll.u32 %s219_s0, 4  ;;  %s11_s17 = int_to_ptr.vmem [resolvable:$true] %s10_s17 }
   0x2   :  { %13 = dma.vmem_to_smem %s11_s17, 16, %s161_s18, [#allocation4] }
   0x3   :  { %149 = dma.done.wait [#allocation4], 16 }
   0x4   :  { %150 = vsyncadd [#allocation4], 4294967280 }
   0x5   :  { %16 = sfence }
   0x6   :  { %s191_s19 = smov 0  }
   0x7 LB: > { %s29_s20 = sld [smem:[#allocation5 + %s155_s19]]  ;;  %s31_s21 = scalar_lea.vmem [#allocation2], %s155_s19  ;;  %s155_s19 = sphi %s191_s19, %s27_s19  }
   0x8   : > { %s41_s22 = sshll.u32 %s31_s21, 4  ;;  %s121_s30 = scalar_lea.hbm %s221_s2, 88  ;;  %s42_s22 = int_to_ptr.vmem [resolvable:$true] %s41_s22 }
   0xd   : > { %s30_s24 = scalar_lea.hbm %s221_s2, %s29_s20 }
   0xe   : > { %s39_s25 = sshll.u32 %s30_s24, 4  ;;  %s40_s25 = int_to_ptr.hbm [resolvable:$true] %s39_s25 }
   0xf   : > { %s117_s26 = sshra.s32 %s40_s25, 4  ;;  %s118_s26 = int_to_ptr.hbm [resolvable:$true] %s117_s26 }
  0x10   : > { %s119_s27 = scalar_lea.hbm %s118_s26, 1  ;;  %p122_p1 = scmp.lt.s32.totalorder %s118_s26, %s221_s2 }
  0x11   : > { %p120_p0 = scmp.ne.s32.totalorder %s118_s26, %s119_s27  ;;  %p123_p2 = scmp.lt.s32.totalorder %s121_s30, %s119_s27 }
  0x13   : > { %p124_p3 = por %p123_p2, %p122_p1 }
  0x15   : > { %p125_p4 = pnand %p124_p3, %p120_p0 }
  0x17   : > { %128 = shalt.err (!%p125_p4)  }
  0x18   : > { %s129_s7 = sshra.s32 %s42_s22, 4  ;;  %s162_s9 = smov [#allocation2]   ;;  %s130_s7 = int_to_ptr.vmem [resolvable:$true] %s129_s7 }
  0x19   : > { %s131_s8 = scalar_lea.vmem %s130_s7, 1  ;;  %s133_s10 = scalar_lea.vmem %s162_s9, 8 }
  0x1a   : > { %p132_p5 = scmp.ne.s32.totalorder %s130_s7, %s131_s8  ;;  %p134_p6 = scmp.lt.s32.totalorder %s130_s7, [#allocation2] }
  0x1b   : > { %p135_p7 = scmp.lt.s32.totalorder %s133_s10, %s131_s8 }
  0x1d   : > { %p136_p8 = por %p135_p7, %p134_p6 }
  0x1f   : > { %p137_p9 = pnand %p136_p8, %p132_p5 }
  0x21   : > { %140 = shalt.err (!%p137_p9)  }
  0x22   : > { %44 = dma.hbm_to_vmem [thread:$0]  %s40_s25, 16, %s42_s22, [#allocation3] }
  0x23   : > { %s27_s19 = sadd.s32 1, %s155_s19  }
  0x24   : > { %p24_p10 = scmp.ge.s32.totalorder %s27_s19, 8  }
  0x25   :  { %s157_s11 = smov (%p24_p10), 0  }
  0x26   :  { %26 = sbr.rel (!%p24_p10) target bundleno = 7 (0x7), region = 48 }
  0x2b LB: > { %151 = dma.done.wait [#allocation3], 16  ;;  %s159_s11 = sphi %s157_s11, %s50_s11  }
  0x2c   : > { %152 = vsyncadd [#allocation3], 4294967280  ;;  %s50_s11 = sadd.s32 1, %s159_s11  }
  0x2d   : > { %p47_p11 = scmp.ge.s32.totalorder %s50_s11, 8  }
  0x2e   :  { %v53_v0 = vld [vmem:[%s220_s1] sm:$0xff] (%p47_p11)  ;;  %vm63_vm0 = vcmask (%p47_p11), 7168  }
  0x2f   :  { %49 = sbr.rel (!%p47_p11) target bundleno = 43 (0x2b), region = 59  ;;  %v54_v1 = vld [vmem:[#allocation2] sm:$0xff] (%p47_p11) }
  0x30   :  { %v55_v2 = vsub.f32 (%p47_p11), %v53_v0, %v54_v1  ;;  %v59_v4 = vld [vmem:[%s222_s3] sm:$0xff] (%p47_p11) }
  0x32   :  { %v56_v3 = vmul.f32 (%p47_p11), %v55_v2, %v55_v2 }
  0x34   :  { %57 = vadd.xlane.f32.xlu0 %v56_v3 }
  0xa7   :  { %v58_v5 = vpop.xlane.xlu0 %57 }
  0xa8   :  { %v60_v6 = vmul.f32 %v59_v4, %v58_v5 }
  0xaa   :  { %v61_v7 = vmax.f32 %v60_v6, 1e-12 }
  0xac   :  { %v62_v8 = vmin.f32 %v61_v7, 1e+12 }
  0xae   :  { %64 = vst.msk [vmem:[%s223_s4] sm:$0xff] %vm63_vm0, %v62_v8 }
  0xaf   :  { %69 = vsyncmov [#allocation3] }
  0xb2   :  { %s70_s17 = vpop.sfrf %69 }
  0xb3   :  { %p87_p12 = scmp.ne.s32.totalorder %s70_s17, 0 }
  0xb5   :  { %74 = shalt.err (%p87_p12)  }

</bundles_post_ra>
